<compile_context>
chip_gen: v7x
topology: tpu7x:2x2x1
jax: 0.10.0
libtpu: 0.0.40
codegen_flags: <defaults>
</compile_context>

<pallas_src>
from functools import partial

import jax
import jax.numpy as jnp
from jax.experimental import pallas as pl
from jax.experimental.pallas import tpu as pltpu


def _round_up(a, b):
    return (a + b - 1) // b * b


def _vmem_capacity_bytes():
    """Per-core VMEM capacity; conservative 64 MiB (v7x) fallback."""
    try:
        info = pltpu.get_tpu_info()
        cap = getattr(info, "vmem_capacity_bytes", None)
        if cap:
            return int(cap)
    except Exception:
        pass
    return 64 * 1024 * 1024


def _fit_tm(tm, dim, kc, hidden_pad, num_t, act_bytes, w_bytes, budget):
    """Shrink the row tile until the per-step VMEM footprint (streams,
    resident weight stacks, f32 intermediates) fits the chip budget."""

    def vm(r, c, b):  # VMEM footprint of an (r, c) tile (lane/sublane padded)
        return _round_up(max(r, 1), 8) * _round_up(max(c, 1), 128) * b

    # Weight stacks are fetched once but conservatively count default 2x buffers.
    weights = 2 * (num_t * vm(dim, hidden_pad, w_bytes)
                   + vm(kc, num_t * hidden_pad, w_bytes)
                   + num_t * vm(hidden_pad, dim, w_bytes)
                   + num_t * vm(1, dim, w_bytes))
    while tm > 16:
        streams = 2 * (2 * vm(tm, dim, act_bytes) + vm(tm, kc, act_bytes))
        interm = (vm(tm, num_t * hidden_pad, 4)      # cond_all (f32)
                  + 2 * vm(tm, hidden_pad, 4)        # z, a (f32)
                  + 4 * vm(tm, dim, 4))              # x, xm, out, tmp (f32)
        if weights + streams + interm <= budget:
            break
        tm //= 2
    return max(16, _round_up(tm, 16))


def _flow_fused_kernel(x_ref, c_ref, w1x_ref, w1c_ref, w2_ref, b2_ref, o_ref):
    num_t = w1x_ref.shape[0]                 # static: number of transforms
    hidden_pad = w1x_ref.shape[2]            # static: lane-padded hidden width
    kc = c_ref.shape[1]                      # [h, lat, t, 1, mask, tanh(t)]

    c = c_ref[...]                                         # (TM, kc)
    m = c[:, kc - 2:kc - 1].astype(jnp.float32)            # mask     (TM, 1)
    tt = c[:, kc - 1:kc].astype(jnp.float32)               # tanh(t)  (TM, 1)
    x = x_ref[...].astype(jnp.float32)                     # (TM, dim)

    # One wide MXU pass covers h@W1h + lat@W1l + t*W1t + b1 for ALL transforms
    # (the mask / tanh(t) columns hit zero weight rows, so they are inert).
    cond_all = jnp.dot(c.astype(w1c_ref.dtype), w1c_ref[...],
                       preferred_element_type=jnp.float32)  # (TM, T*Hp)

    # Static unroll over the (small) transform stack; weights are VMEM-resident.
    # TODO(synk): for very deep stacks switch to lax.fori_loop over the stacked
    # weights to bound vreg live ranges.
    for tr in range(num_t):
        xm = x * m
        z = jnp.dot(xm.astype(w1x_ref.dtype), w1x_ref[tr],
                    preferred_element_type=jnp.float32)
        z = z + cond_all[:, tr * hidden_pad:(tr + 1) * hidden_pad]
        a = jnp.tanh(z)                          # f32 elementwise (v5e-safe)
        out = (jnp.dot(a.astype(w2_ref.dtype), w2_ref[tr],
                       preferred_element_type=jnp.float32)
               + b2_ref[tr].astype(jnp.float32))
        x = xm + tt * out

    o_ref[...] = x.astype(o_ref.dtype)


@partial(jax.jit,
         static_argnames=("reverse", "tm", "storage_dtype", "compute_dtype"))
def flow_forward(x, h, transforms, latent=None, mask=None, t=None,
                 reverse=False, *, tm=1024, storage_dtype=None,
                 compute_dtype=None):
    """Pallas implementation of Flow.forward.

    x:      (..., dim)   sample from the base density
    h:      (..., hdim)  graph embedding
    latent: (..., ldim)  conditioning vector (or None)
    mask:   (..., 1)     mask (or None -> 1)
    t:      (..., 1)     flow end time (or None -> 1)
    storage_dtype: optional HBM storage dtype (e.g. jnp.bfloat16).
    compute_dtype: optional MXU operand dtype (e.g. jnp.bfloat16); accumulation
                   and element-wise math stay in f32.
    """
    orig_dtype = x.dtype
    lead = x.shape[:-1]
    dim = x.shape[-1]
    hdim = h.shape[-1]

    num_t = len(transforms)
    if num_t == 0:
        return x

    if mask is None:
        mask = jnp.ones(lead + (1,), jnp.float32)
    if t is None:
        t = jnp.ones(lead + (1,), jnp.float32)
    if latent is None:
        # TODO(synk): assumes a homogeneous transform stack (same latent width).
        latent = jnp.zeros(lead + (transforms[0]["w1l"].shape[0],), jnp.float32)
    ldim = latent.shape[-1]

    n = 1
    for s in lead:
        n *= s

    sdt = jnp.dtype(storage_dtype) if storage_dtype is not None else jnp.dtype(orig_dtype)
    cdt = jnp.dtype(compute_dtype) if compute_dtype is not None else sdt

    hidden = transforms[0]["w2"].shape[0]
    hidden_pad = _round_up(hidden, 128)      # lane-dense z / a tiles
    kc = hdim + ldim + 4                     # [h, lat, t, 1, mask, tanh(t)]

    # ---- single packed conditioning stream (fuses under jit) -------------
    x2d = x.reshape(n, dim).astype(jnp.float32)
    t2d = t.reshape(n, 1).astype(jnp.float32)
    c2d = jnp.concatenate(
        [h.reshape(n, hdim).astype(jnp.float32),
         latent.reshape(n, ldim).astype(jnp.float32),
         t2d,
         jnp.ones((n, 1), jnp.float32),
         mask.reshape(n, 1).astype(jnp.float32),
         jnp.tanh(t2d)],                     # tanh(t) hoisted out of the T loop
        axis=-1)

    # ---- chip-aware tile sizing -------------------------------------------
    vmem_cap = _vmem_capacity_bytes()
    budget = int(vmem_cap * 0.70)
    vmem_limit = min(int(vmem_cap * 0.85), budget + (16 << 20))

    tm = max(16, min(_round_up(tm, 16), _round_up(n, 16)))
    # keep >= ~4 grid steps when n allows it (v7x 2-TC sharding + pipelining)
    tm = min(tm, max(16, _round_up(-(-n // 4), 16)))
    tm = _fit_tm(tm, dim, kc, hidden_pad, num_t, sdt.itemsize, cdt.itemsize,
                 budget)
    n_pad = _round_up(n, tm)

    xp = jnp.pad(x2d, ((0, n_pad - n), (0, 0))).astype(sdt)
    cp = jnp.pad(c2d, ((0, n_pad - n), (0, 0))).astype(sdt)

    # ---- stacked, hidden-padded weights (VMEM resident) --------------------
    ts = transforms[::-1] if reverse else transforms
    hp = hidden_pad - hidden

    def cond_w(p):
        w = jnp.concatenate(
            [p["w1h"], p["w1l"], p["w1t"], p["b1"],
             jnp.zeros((2, hidden), p["w1h"].dtype)], axis=0)   # mask / tanh(t)
        return jnp.pad(w.astype(jnp.float32), ((0, 0), (0, hp)))

    w1x_s = jnp.stack([jnp.pad(p["w1x"].astype(jnp.float32), ((0, 0), (0, hp)))
                       for p in ts]).astype(cdt)                     # (T, dim, Hp)
    w1c_s = jnp.concatenate([cond_w(p) for p in ts],
                            axis=1).astype(cdt)                      # (kc, T*Hp)
    w2_s = jnp.stack([jnp.pad(p["w2"].astype(jnp.float32), ((0, hp), (0, 0)))
                      for p in ts]).astype(cdt)                      # (T, Hp, dim)
    b2_s = jnp.stack([p["b2"].astype(jnp.float32)
                      for p in ts]).astype(cdt)                      # (T, 1, dim)

    row = lambda i: (i, 0)
    whole3 = lambda i: (0, 0, 0)
    whole2 = lambda i: (0, 0)

    out = pl.pallas_call(
        _flow_fused_kernel,
        out_shape=jax.ShapeDtypeStruct((n_pad, dim), sdt),
        grid_spec=pltpu.PrefetchScalarGridSpec(
            num_scalar_prefetch=0,
            grid=(n_pad // tm,),
            in_specs=[
                pl.BlockSpec((tm, dim), row),                       # x (natural width)
                pl.BlockSpec((tm, kc), row),                        # [h,lat,t,1,mask,tanh(t)]
                pl.BlockSpec((num_t, dim, hidden_pad), whole3),     # stacked W1x
                pl.BlockSpec((kc, num_t * hidden_pad), whole2),     # stacked conditioning W1
                pl.BlockSpec((num_t, hidden_pad, dim), whole3),     # stacked W2
                pl.BlockSpec((num_t, 1, dim), whole3),              # stacked b2
            ],
            out_specs=pl.BlockSpec((tm, dim), row),                 # natural width
        ),
        compiler_params=pltpu.CompilerParams(
            dimension_semantics=("parallel",),
            vmem_limit_bytes=int(vmem_limit),
        ),
    )(xp, cp, w1x_s, w1c_s, w2_s, b2_s)

    return out[:n, :].astype(orig_dtype).reshape(lead + (dim,))


def _reference_forward(x, h, transforms, latent, mask, t, reverse=False):
    ts = transforms[::-1] if reverse else transforms
    for p in ts:
        xm = x * mask
        z = (xm @ p["w1x"] + h @ p["w1h"] + latent @ p["w1l"]
             + t * p["w1t"] + p["b1"])
        out = jnp.tanh(z) @ p["w2"] + p["b2"]
        x = xm + jnp.tanh(t) * out
    return x


def make_transform_params(key, dim, hdim, ldim, hidden, dtype=jnp.float32):
    ks = jax.random.split(key, 6)
    s = 0.3
    return {
        "w1x": s * jax.random.normal(ks[0], (dim, hidden), dtype),
        "w1h": s * jax.random.normal(ks[1], (hdim, hidden), dtype),
        "w1l": s * jax.random.normal(ks[2], (ldim, hidden), dtype),
        "w1t": s * jax.random.normal(ks[3], (1, hidden), dtype),
        "b1": jnp.zeros((1, hidden), dtype),
        "w2": s * jax.random.normal(ks[4], (hidden, dim), dtype),
        "b2": s * jax.random.normal(ks[5], (1, dim), dtype),
    }


if __name__ == "__main__":
    # Small shapes: batch=2, seq=8 -> N=16 rows, dim=8, hdim=16, ldim=4, hidden=32.
    B, S, DIM, HDIM, LDIM, HID = 2, 8, 8, 16, 4, 32
    NUM_TRANSFORMS = 3

    root = jax.random.PRNGKey(0)
    k_x, k_h, k_l, k_t, k_m, k_p = jax.random.split(root, 6)

    x = jax.random.normal(k_x, (B, S, DIM), jnp.float32)
    h = jax.random.normal(k_h, (B, S, HDIM), jnp.float32)
    latent = jax.random.normal(k_l, (B, S, LDIM), jnp.float32)
    t = jax.random.uniform(k_t, (B, S, 1), jnp.float32)
    mask = (jax.random.uniform(k_m, (B, S, 1)) > 0.2).astype(jnp.float32)

    transforms = [
        make_transform_params(k, DIM, HDIM, LDIM, HID)
        for k in jax.random.split(k_p, NUM_TRANSFORMS)
    ]

    # forward (fused f32 kernel) vs pure-JAX reference
    y = jax.block_until_ready(
        flow_forward(x, h, transforms, latent=latent, mask=mask, t=t,
                     reverse=False))
    y_ref = _reference_forward(x, h, transforms, latent, mask, t, reverse=False)
    assert y.shape == x.shape
    assert jnp.allclose(y, y_ref, atol=1e-4, rtol=1e-4), "forward mismatch"

    # reverse=True path (inverse ordering of transforms)
    y_rev = jax.block_until_ready(
        flow_forward(x, h, transforms, latent=latent, mask=mask, t=t,
                     reverse=True))
    y_rev_ref = _reference_forward(x, h, transforms, latent, mask, t,
                                   reverse=True)
    assert jnp.allclose(y_rev, y_rev_ref, atol=1e-4, rtol=1e-4), "reverse mismatch"

    # default latent / mask / t (matches PyTorch defaults: mask -> 1)
    y_def = jax.block_until_ready(flow_forward(x, h, transforms))
    ones = jnp.ones((B, S, 1), jnp.float32)
    y_def_ref = _reference_forward(x, h, transforms,
                                   jnp.zeros((B, S, LDIM), jnp.float32),
                                   ones, ones, reverse=False)
    assert jnp.allclose(y_def, y_def_ref, atol=1e-4, rtol=1e-4), "default-args mismatch"

    # bf16 storage + bf16 MXU operands (bandwidth / native-MXU path for
    # v5e/v6e/v7x): f32 accumulation and f32 element-wise, loose smoke-check.
    y_bf16 = jax.block_until_ready(
        flow_forward(x, h, transforms, latent=latent, mask=mask, t=t,
                     reverse=False, storage_dtype=jnp.bfloat16,
                     compute_dtype=jnp.bfloat16))
    assert y_bf16.shape == x.shape
    assert bool(jnp.all(jnp.isfinite(y_bf16)))
    assert jnp.allclose(y_bf16, y_ref, atol=0.5, rtol=0.1), "bf16 path diverged"

    print("KERNEL_OK")
</pallas_src>

<mosaic_0001>
module attributes {stable_mosaic.version = 11 : i64} {
  func.func @_flow_fused_kernel(%arg0: i32, %arg1: memref<16x8xf32, #tpu.memory_space<vmem>>, %arg2: memref<16x24xf32, #tpu.memory_space<vmem>>, %arg3: memref<3x8x128xf32, #tpu.memory_space<vmem>>, %arg4: memref<24x384xf32, #tpu.memory_space<vmem>>, %arg5: memref<3x128x8xf32, #tpu.memory_space<vmem>>, %arg6: memref<3x1x8xf32, #tpu.memory_space<vmem>>, %arg7: memref<16x8xf32, #tpu.memory_space<vmem>>) attributes {dimension_semantics = [#tpu.dimension_semantics<parallel>], iteration_bounds = array<i64: 1>, scalar_prefetch = 0 : i64, scratch_operands = 0 : i64, tpu.core_type = #tpu.core_type<tc>, window_params = [{transform_indices = @transform_0, window_bounds = array<i64: 16, 8>}, {transform_indices = @transform_1, window_bounds = array<i64: 16, 24>}, {pipeline_mode = #tpu.pipeline_mode<synchronous>, transform_indices = @transform_2, window_bounds = array<i64: 3, 8, 128>}, {pipeline_mode = #tpu.pipeline_mode<synchronous>, transform_indices = @transform_3, window_bounds = array<i64: 24, 384>}, {pipeline_mode = #tpu.pipeline_mode<synchronous>, transform_indices = @transform_4, window_bounds = array<i64: 3, 128, 8>}, {pipeline_mode = #tpu.pipeline_mode<synchronous>, transform_indices = @transform_5, window_bounds = array<i64: 3, 1, 8>}, {transform_indices = @transform_6, window_bounds = array<i64: 16, 8>}]} {
    %c0 = arith.constant 0 : index
    %c0_0 = arith.constant 0 : index
    %0 = vector.load %arg2[%c0, %c0_0] : memref<16x24xf32, #tpu.memory_space<vmem>>, vector<16x24xf32>
    %1 = vector.extract_strided_slice %0 {offsets = [0, 22], sizes = [16, 1], strides = [1, 1]} : vector<16x24xf32> to vector<16x1xf32>
    %2 = vector.extract_strided_slice %0 {offsets = [0, 23], sizes = [16, 1], strides = [1, 1]} : vector<16x24xf32> to vector<16x1xf32>
    %c0_1 = arith.constant 0 : index
    %c0_2 = arith.constant 0 : index
    %3 = vector.load %arg1[%c0_1, %c0_2] : memref<16x8xf32, #tpu.memory_space<vmem>>, vector<16x8xf32>
    %c0_3 = arith.constant 0 : index
    %c0_4 = arith.constant 0 : index
    %4 = vector.load %arg4[%c0_3, %c0_4] : memref<24x384xf32, #tpu.memory_space<vmem>>, vector<24x384xf32>
    %cst = arith.constant dense<0.000000e+00> : vector<16x384xf32>
    %5 = tpu.matmul %0, %4, %cst {dimension_numbers = #tpu.dot_dimension_numbers<[1], [0], [0], [1], [0, 0, 1, 1], [], []>} : vector<16x24xf32>, vector<24x384xf32>, vector<16x384xf32> -> vector<16x384xf32>
    %6 = vector.broadcast %1 : vector<16x1xf32> to vector<16x8xf32>
    %7 = arith.mulf %3, %6 : vector<16x8xf32>
    %c0_5 = arith.constant 0 : index
    %c0_6 = arith.constant 0 : index
    %c0_7 = arith.constant 0 : index
    %8 = vector.load %arg3[%c0_5, %c0_6, %c0_7] : memref<3x8x128xf32, #tpu.memory_space<vmem>>, vector<1x8x128xf32>
    %9 = vector.shape_cast %8 : vector<1x8x128xf32> to vector<8x128xf32>
    %cst_8 = arith.constant dense<0.000000e+00> : vector<16x128xf32>
    %10 = tpu.matmul %7, %9, %cst_8 {dimension_numbers = #tpu.dot_dimension_numbers<[1], [0], [0], [1], [0, 0, 1, 1], [], []>} : vector<16x8xf32>, vector<8x128xf32>, vector<16x128xf32> -> vector<16x128xf32>
    %11 = vector.extract_strided_slice %5 {offsets = [0, 0], sizes = [16, 128], strides = [1, 1]} : vector<16x384xf32> to vector<16x128xf32>
    %12 = arith.addf %10, %11 : vector<16x128xf32>
    %13 = math.tanh %12 : vector<16x128xf32>
    %c0_9 = arith.constant 0 : index
    %c0_10 = arith.constant 0 : index
    %c0_11 = arith.constant 0 : index
    %14 = vector.load %arg5[%c0_9, %c0_10, %c0_11] : memref<3x128x8xf32, #tpu.memory_space<vmem>>, vector<1x128x8xf32>
    %15 = vector.shape_cast %14 : vector<1x128x8xf32> to vector<128x8xf32>
    %cst_12 = arith.constant dense<0.000000e+00> : vector<16x8xf32>
    %16 = tpu.matmul %13, %15, %cst_12 {dimension_numbers = #tpu.dot_dimension_numbers<[1], [0], [0], [1], [0, 0, 1, 1], [], []>} : vector<16x128xf32>, vector<128x8xf32>, vector<16x8xf32> -> vector<16x8xf32>
    %c0_13 = arith.constant 0 : index
    %c0_14 = arith.constant 0 : index
    %c0_15 = arith.constant 0 : index
    %17 = vector.load %arg6[%c0_13, %c0_14, %c0_15] : memref<3x1x8xf32, #tpu.memory_space<vmem>>, vector<1x1x8xf32>
    %18 = vector.shape_cast %17 : vector<1x1x8xf32> to vector<1x8xf32>
    %19 = vector.broadcast %18 : vector<1x8xf32> to vector<16x8xf32>
    %20 = arith.addf %16, %19 : vector<16x8xf32>
    %21 = vector.broadcast %2 : vector<16x1xf32> to vector<16x8xf32>
    %22 = arith.mulf %21, %20 : vector<16x8xf32>
    %23 = arith.addf %7, %22 : vector<16x8xf32>
    %24 = vector.broadcast %1 : vector<16x1xf32> to vector<16x8xf32>
    %25 = arith.mulf %23, %24 : vector<16x8xf32>
    %c1 = arith.constant 1 : index
    %c0_16 = arith.constant 0 : index
    %c0_17 = arith.constant 0 : index
    %26 = vector.load %arg3[%c1, %c0_16, %c0_17] : memref<3x8x128xf32, #tpu.memory_space<vmem>>, vector<1x8x128xf32>
    %27 = vector.shape_cast %26 : vector<1x8x128xf32> to vector<8x128xf32>
    %cst_18 = arith.constant dense<0.000000e+00> : vector<16x128xf32>
    %28 = tpu.matmul %25, %27, %cst_18 {dimension_numbers = #tpu.dot_dimension_numbers<[1], [0], [0], [1], [0, 0, 1, 1], [], []>} : vector<16x8xf32>, vector<8x128xf32>, vector<16x128xf32> -> vector<16x128xf32>
    %29 = vector.extract_strided_slice %5 {offsets = [0, 128], sizes = [16, 128], strides = [1, 1]} : vector<16x384xf32> to vector<16x128xf32>
    %30 = arith.addf %28, %29 : vector<16x128xf32>
    %31 = math.tanh %30 : vector<16x128xf32>
    %c1_19 = arith.constant 1 : index
    %c0_20 = arith.constant 0 : index
    %c0_21 = arith.constant 0 : index
    %32 = vector.load %arg5[%c1_19, %c0_20, %c0_21] : memref<3x128x8xf32, #tpu.memory_space<vmem>>, vector<1x128x8xf32>
    %33 = vector.shape_cast %32 : vector<1x128x8xf32> to vector<128x8xf32>
    %cst_22 = arith.constant dense<0.000000e+00> : vector<16x8xf32>
    %34 = tpu.matmul %31, %33, %cst_22 {dimension_numbers = #tpu.dot_dimension_numbers<[1], [0], [0], [1], [0, 0, 1, 1], [], []>} : vector<16x128xf32>, vector<128x8xf32>, vector<16x8xf32> -> vector<16x8xf32>
    %c1_23 = arith.constant 1 : index
    %c0_24 = arith.constant 0 : index
    %c0_25 = arith.constant 0 : index
    %35 = vector.load %arg6[%c1_23, %c0_24, %c0_25] : memref<3x1x8xf32, #tpu.memory_space<vmem>>, vector<1x1x8xf32>
    %36 = vector.shape_cast %35 : vector<1x1x8xf32> to vector<1x8xf32>
    %37 = vector.broadcast %36 : vector<1x8xf32> to vector<16x8xf32>
    %38 = arith.addf %34, %37 : vector<16x8xf32>
    %39 = vector.broadcast %2 : vector<16x1xf32> to vector<16x8xf32>
    %40 = arith.mulf %39, %38 : vector<16x8xf32>
    %41 = arith.addf %25, %40 : vector<16x8xf32>
    %42 = vector.broadcast %1 : vector<16x1xf32> to vector<16x8xf32>
    %43 = arith.mulf %41, %42 : vector<16x8xf32>
    %c2 = arith.constant 2 : index
    %c0_26 = arith.constant 0 : index
    %c0_27 = arith.constant 0 : index
    %44 = vector.load %arg3[%c2, %c0_26, %c0_27] : memref<3x8x128xf32, #tpu.memory_space<vmem>>, vector<1x8x128xf32>
    %45 = vector.shape_cast %44 : vector<1x8x128xf32> to vector<8x128xf32>
    %cst_28 = arith.constant dense<0.000000e+00> : vector<16x128xf32>
    %46 = tpu.matmul %43, %45, %cst_28 {dimension_numbers = #tpu.dot_dimension_numbers<[1], [0], [0], [1], [0, 0, 1, 1], [], []>} : vector<16x8xf32>, vector<8x128xf32>, vector<16x128xf32> -> vector<16x128xf32>
    %47 = vector.extract_strided_slice %5 {offsets = [0, 256], sizes = [16, 128], strides = [1, 1]} : vector<16x384xf32> to vector<16x128xf32>
    %48 = arith.addf %46, %47 : vector<16x128xf32>
    %49 = math.tanh %48 : vector<16x128xf32>
    %c2_29 = arith.constant 2 : index
    %c0_30 = arith.constant 0 : index
    %c0_31 = arith.constant 0 : index
    %50 = vector.load %arg5[%c2_29, %c0_30, %c0_31] : memref<3x128x8xf32, #tpu.memory_space<vmem>>, vector<1x128x8xf32>
    %51 = vector.shape_cast %50 : vector<1x128x8xf32> to vector<128x8xf32>
    %cst_32 = arith.constant dense<0.000000e+00> : vector<16x8xf32>
    %52 = tpu.matmul %49, %51, %cst_32 {dimension_numbers = #tpu.dot_dimension_numbers<[1], [0], [0], [1], [0, 0, 1, 1], [], []>} : vector<16x128xf32>, vector<128x8xf32>, vector<16x8xf32> -> vector<16x8xf32>
    %c2_33 = arith.constant 2 : index
    %c0_34 = arith.constant 0 : index
    %c0_35 = arith.constant 0 : index
    %53 = vector.load %arg6[%c2_33, %c0_34, %c0_35] : memref<3x1x8xf32, #tpu.memory_space<vmem>>, vector<1x1x8xf32>
    %54 = vector.shape_cast %53 : vector<1x1x8xf32> to vector<1x8xf32>
    %55 = vector.broadcast %54 : vector<1x8xf32> to vector<16x8xf32>
    %56 = arith.addf %52, %55 : vector<16x8xf32>
    %57 = vector.broadcast %2 : vector<16x1xf32> to vector<16x8xf32>
    %58 = arith.mulf %57, %56 : vector<16x8xf32>
    %59 = arith.addf %43, %58 : vector<16x8xf32>
    %c0_36 = arith.constant 0 : index
    %c0_37 = arith.constant 0 : index
    %60 = vector.load %arg7[%c0_36, %c0_37] : memref<16x8xf32, #tpu.memory_space<vmem>>, vector<16x8xf32>
    tpu.vector_store %arg7[%c0_36, %c0_37], %59 {strides = array<i32>} : memref<16x8xf32, #tpu.memory_space<vmem>>, vector<16x8xf32>,
    return
  }
  func.func @transform_0(%arg0: i32) -> (i32, i32) {
    %c0_i32 = arith.constant 0 : i32
    %c0_i32_0 = arith.constant 0 : i32
    return %arg0, %c0_i32 : i32, i32
  }
  func.func @transform_1(%arg0: i32) -> (i32, i32) {
    %c0_i32 = arith.constant 0 : i32
    %c0_i32_0 = arith.constant 0 : i32
    return %arg0, %c0_i32 : i32, i32
  }
  func.func @transform_2(%arg0: i32) -> (i32, i32, i32) {
    %c0_i32 = arith.constant 0 : i32
    %c0_i32_0 = arith.constant 0 : i32
    %c0_i32_1 = arith.constant 0 : i32
    %c0_i32_2 = arith.constant 0 : i32
    return %c0_i32, %c0_i32_0, %c0_i32_1 : i32, i32, i32
  }
  func.func @transform_3(%arg0: i32) -> (i32, i32) {
    %c0_i32 = arith.constant 0 : i32
    %c0_i32_0 = arith.constant 0 : i32
    %c0_i32_1 = arith.constant 0 : i32
    return %c0_i32, %c0_i32_0 : i32, i32
  }
  func.func @transform_4(%arg0: i32) -> (i32, i32, i32) {
    %c0_i32 = arith.constant 0 : i32
    %c0_i32_0 = arith.constant 0 : i32
    %c0_i32_1 = arith.constant 0 : i32
    %c0_i32_2 = arith.constant 0 : i32
    return %c0_i32, %c0_i32_0, %c0_i32_1 : i32, i32, i32
  }
  func.func @transform_5(%arg0: i32) -> (i32, i32, i32) {
    %c0_i32 = arith.constant 0 : i32
    %c0_i32_0 = arith.constant 0 : i32
    %c0_i32_1 = arith.constant 0 : i32
    %c0_i32_2 = arith.constant 0 : i32
    return %c0_i32, %c0_i32_0, %c0_i32_1 : i32, i32, i32
  }
  func.func @transform_6(%arg0: i32) -> (i32, i32) {
    %c0_i32 = arith.constant 0 : i32
    %c0_i32_0 = arith.constant 0 : i32
    return %arg0, %c0_i32 : i32, i32
  }
}

</mosaic_0001>

<bundles_post_ra>
// kernel: flow_forward.1
= control target key start
LH: loop header
LB: loop body
LE: loop exit
PB: predicated region body
PF: predicated region fallthrough
CT: control target
= control target key end

     0   :  { %v1198_v2 = vmov 22   ;;  %v1199_v6 = vmov 0.0   ;;  %s1510_s0 = inlined_call_operand.vmem [shape: f32[16,8], index: 0, kind: input, shape index: {}]   ;;  %s1511_s1 = inlined_call_operand.vmem [shape: f32[16,24], index: 1, kind: input, shape index: {}]   ;;  %s1512_s2 = inlined_call_operand.vmem [shape: f32[3,8,128], index: 2, kind: input, shape index: {}]   ;;  %s1513_s3 = inlined_call_operand.vmem [shape: f32[24,384], index: 3, kind: input, shape index: {}]   ;;  %s1514_s4 = inlined_call_operand.vmem [shape: f32[3,128,8], index: 4, kind: input, shape index: {}]   ;;  %s1515_s5 = inlined_call_operand.vmem [shape: f32[3,1,8], index: 5, kind: input, shape index: {}]   ;;  %s1516_s6 = inlined_call_operand.hbm [shape: f32[16,8], index: 6, kind: output, shape index: {}]  }
   0x1   :  { %v1242_v0 = vld [vmem:[%s1511_s1] sm:$0xff]  ;;  %v29_v1 = vld [vmem:[%s1513_s3 + $0x8] sm:$0xff]  ;;  %1159 = vset.pattern.permute.xlu0 %v1198_v2  ;;  %v31_v5 = vld [vmem:[%s1513_s3 + $0x18] sm:$0xff]  ;;  %108 = vmatprep.mubr.f32.mxu1 %v1199_v6 }
   0x2   :  { %v32_v3 = vld [vmem:[%s1513_s3 + $0x20] sm:$0xff]  ;;  %197 = vperm.xlu0 %1159, %v1242_v0   ;;  %v1260_v7 = vld [vmem:[%s1511_s1 + $0x8] sm:$0xff]  ;;  %v35_v10 = vld [vmem:[%s1513_s3 + $0x38] sm:$0xff] }
   0x3   :  { %v28_v4 = vld [vmem:[%s1513_s3] sm:$0xff]  ;;  %v1047_v8 = vpack.c.bf16 %v32_v3, %v29_v1  ;;  %v30_v11 = vld [vmem:[%s1513_s3 + $0x10] sm:$0xff]  ;;  %v33_v12 = vld [vmem:[%s1513_s3 + $0x28] sm:$0xff] }
   0x4   :  { %v1049_v9 = vpack.c.bf16 %v31_v5, %v28_v4 }
   0x5   :  { %1048 = vmatprep.subr.bf16.mxu1 %v1047_v8 }
   0x6   :  { %11 = vsyncpa [#allocation3], 0  ;;  %1050 = vmatpush1.bf16.msra.mxu1 %v1049_v9  ;;  %201 = vperm.xlu0 %1159, %v1260_v7   ;;  %v34_v13 = vld [vmem:[%s1513_s3 + $0x30] sm:$0xff]  ;;  %v1051_v14 = vpack.c.bf16 %v33_v12, %v30_v11  ;;  %vm37_vm0 = vcmask 195584   ;;  %v291_v15 = vld [vmem:[%s1514_s4] sm:$0xff]  ;;  %vm207_vm1 = vcmask 64512  }
   0x7   :  { %48 = vmatprep.subr.mxu1 %v35_v10  ;;  %v292_v16 = vld [vmem:[%s1514_s4 + $0x8] sm:$0xff]  ;;  %v36_v17 = vld [vmem:[%s1513_s3 + $0x40] sm:$0xff]  ;;  %v293_v20 = vld [vmem:[%s1514_s4 + $0x10] sm:$0xff]  ;;  %v1200_v51 = vmov 23  }
   0x8   :  { %v1055_v18 = vpack.c.bf16 %v292_v16, %v291_v15  ;;  %v206_v19 = vld [vmem:[%s1512_s2] sm:$0xff]  ;;  %v294_v21 = vld [vmem:[%s1514_s4 + $0x18] sm:$0xff]  ;;  %v296_v24 = vld [vmem:[%s1514_s4 + $0x28] sm:$0xff]  ;;  %1160 = vset.pattern.permute.xlu1 %v1200_v51 }
   0x9   :  { %v1059_v22 = vpack.c.bf16 %v294_v21, %v293_v20  ;;  %v295_v23 = vld [vmem:[%s1514_s4 + $0x20] sm:$0xff]  ;;  %v297_v25 = vld [vmem:[%s1514_s4 + $0x30] sm:$0xff]  ;;  %v298_v27 = vld [vmem:[%s1514_s4 + $0x38] sm:$0xff]  ;;  %390 = vperm.xlu1 %1160, %v1242_v0  }
   0xa   :  { %49 = vmatpush1.msra.mxu1 %v34_v13  ;;  %1056 = vmatprep.subr.bf16.mxu0 %v1055_v18  ;;  %v1063_v26 = vpack.c.bf16 %v296_v24, %v295_v23  ;;  %v1067_v28 = vpack.c.bf16 %v298_v27, %v297_v25  ;;  %v26_v29 = vld [vmem:[%s1510_s0] sm:$0xff]  ;;  %v27_v32 = vld [vmem:[%s1510_s0 + $0x8] sm:$0xff]  ;;  %v301_v38 = vld [vmem:[%s1514_s4 + $0x50] sm:$0xff] }
   0xb   :  { %801 = vmatmul.mubr.msk.f32.vlgmr.msra.gmra.mrb[0].mxu1 %vm37_vm0, %v1242_v0  ;;  %1052 = vmatprep.subr.bf16.mxu1 %v1051_v14  ;;  %v299_v35 = vld [vmem:[%s1514_s4 + $0x40] sm:$0xff]  ;;  %v300_v36 = vld [vmem:[%s1514_s4 + $0x48] sm:$0xff]  ;;  %v302_v39 = vld [vmem:[%s1514_s4 + $0x58] sm:$0xff] }
   0xc   :  { %1054 = vmatpush3.bf16.msra.mxu1 %v1051_v14  ;;  %114 = vmatprep.mubr.f32.mxu1 %v1199_v6  ;;  %v1071_v37 = vpack.c.bf16 %v300_v36, %v299_v35  ;;  %v1075_v41 = vpack.c.bf16 %v302_v39, %v301_v38  ;;  %v303_v43 = vld [vmem:[%s1514_s4 + $0x60] sm:$0xff]  ;;  %v304_v44 = vld [vmem:[%s1514_s4 + $0x68] sm:$0xff]  ;;  %v305_v45 = vld [vmem:[%s1514_s4 + $0x70] sm:$0xff] }
   0xd   :  { %922 = vmatprep.subr.mxu1 %v36_v17  ;;  %1058 = vmatpush3.bf16.msra.mxu0 %v1055_v18  ;;  %v1079_v46 = vpack.c.bf16 %v304_v44, %v303_v43  ;;  %v306_v47 = vld [vmem:[%s1514_s4 + $0x78] sm:$0xff]  ;;  %v808_v58 = vld [vmem:[%s1512_s2 + $0x8] sm:$0xff]  ;;  %v811_v59 = vld [vmem:[%s1514_s4 + $0x80] sm:$0xff] }
   0xe   :  { %1060 = vmatprep.subr.bf16.mxu0 %v1059_v22  ;;  %v1083_v49 = vpack.c.bf16 %v306_v47, %v305_v45  ;;  %1161 = vset.pattern.permute.xlu0 %v1200_v51  ;;  %v812_v60 = vld [vmem:[%s1514_s4 + $0x88] sm:$0xff]  ;;  %v807_v63 = vld [vmem:[%s1515_s5] ss:$0 sm:$0xff]  ;;  %v813_v9 = vld [vmem:[%s1514_s4 + $0x90] sm:$0xff] }
   0xf   :  { %802 = vmatmul.mubr.msk.f32.gmra.mrb[2].mxu1 %vm37_vm0, %v1260_v7  ;;  %394 = vperm.xlu1 %1160, %v1260_v7   ;;  %v1087_v61 = vpack.c.bf16 %v812_v60, %v811_v59  ;;  %v814_v10 = vld [vmem:[%s1514_s4 + $0x98] sm:$0xff]  ;;  %v815_v14 = vld [vmem:[%s1514_s4 + $0xa0] sm:$0xff]  ;;  %v816_v15 = vld [vmem:[%s1514_s4 + $0xa8] sm:$0xff] }
  0x10   :  { %923 = vmatpush3.msra.mxu1 %v36_v17  ;;  %924 = vmatprep.mubr.msk.f32.mxu1 %vm37_vm0, %v1242_v0  ;;  %v1091_v13 = vpack.c.bf16 %v814_v10, %v813_v9  ;;  %v1095_v16 = vpack.c.bf16 %v816_v15, %v815_v14  ;;  %v817_v17 = vld [vmem:[%s1514_s4 + $0xb0] sm:$0xff]  ;;  %v818_v18 = vld [vmem:[%s1514_s4 + $0xb8] sm:$0xff]  ;;  %v819_v20 = vld [vmem:[%s1514_s4 + $0xc0] sm:$0xff] }
  0x11   :  { %927 = vmatprep.subr.mxu1 %v206_v19  ;;  %1062 = vmatpush3.bf16.msra.mxu0 %v1059_v22  ;;  %v820_v21 = vld [vmem:[%s1514_s4 + $0xc8] sm:$0xff]  ;;  %v821_v23 = vld [vmem:[%s1514_s4 + $0xd0] sm:$0xff]  ;;  %v822_v24 = vld [vmem:[%s1514_s4 + $0xd8] sm:$0xff] }
  0x12   :  { %1064 = vmatprep.subr.bf16.mxu0 %v1063_v26  ;;  %v1103_v22 = vpack.c.bf16 %v820_v21, %v819_v20  ;;  %v1107_v25 = vpack.c.bf16 %v822_v24, %v821_v23  ;;  %v824_v27 = vld [vmem:[%s1514_s4 + $0xe8] sm:$0xff]  ;;  %v834_v43 = vld [vmem:[%s1514_s4 + $0x110] sm:$0xff]  ;;  %v835_v45 = vld [vmem:[%s1514_s4 + $0x118] sm:$0xff] }
  0x13   :  { %925 = vmatmul.mubr.msk.f32.vlgmr.msra.gmra.mrb[4].mxu1 %vm37_vm0, %v1260_v7  ;;  %v836_v47 = vld [vmem:[%s1514_s4 + $0x120] sm:$0xff]  ;;  %v839_v51 = vld [vmem:[%s1514_s4 + $0x138] sm:$0xff] }
  0x14   :  { %928 = vmatpush3.msra.mxu1 %v206_v19  ;;  %v1099_v19 = vpack.c.bf16 %v818_v18, %v817_v17  ;;  %v847_v10 = vld [vmem:[%s1514_s4 + $0x178] sm:$0xff] }
  0x15   :  { %1066 = vmatpush3.bf16.msra.mxu0 %v1063_v26  ;;  %967 = vmatprep.subr.mxu1 %v808_v58  ;;  %v823_v26 = vld [vmem:[%s1514_s4 + $0xe0] sm:$0xff] }
  0x16   :  { %1068 = vmatprep.subr.bf16.mxu0 %v1067_v28 }
  0x19   :  { %1070 = vmatpush3.bf16.msra.mxu0 %v1067_v28  ;;  %v825_v28 = vld [vmem:[%s1514_s4 + $0xf0] sm:$0xff] }
  0x1a   :  { %1072 = vmatprep.subr.bf16.mxu0 %v1071_v37 }
  0x1d   :  { %1074 = vmatpush3.bf16.msra.mxu0 %v1071_v37 }
  0x1e   :  { %1076 = vmatprep.subr.bf16.mxu0 %v1075_v41 }
  0x21   :  { %1078 = vmatpush3.bf16.msra.mxu0 %v1075_v41  ;;  %v832_v41 = vld [vmem:[%s1514_s4 + $0x100] sm:$0xff] }
  0x22   :  { %1080 = vmatprep.subr.bf16.mxu0 %v1079_v46 }
  0x25   :  { %1082 = vmatpush3.bf16.msra.mxu0 %v1079_v46  ;;  %v1123_v46 = vpack.c.bf16 %v835_v45, %v834_v43 }
  0x26   :  { %1084 = vmatprep.subr.bf16.mxu0 %v1083_v49 }
  0x29   :  { %1086 = vmatpush3.bf16.msra.mxu0 %v1083_v49 }
  0x81   :  { %v1316_v30 = vpop.permute.xlu0 %197 }
  0x82   :  { %v204_v31 = vmul.f32 %v1316_v30, %v26_v29  ;;  %v1111_v29 = vpack.c.bf16 %v824_v27, %v823_v26 }
  0x84   :  { %929 = vmatprep.mubr.msk.f32.mxu1 %vm207_vm1, %v204_v31 }
  0x85   :  { %v1323_v33 = vpop.permute.xlu0 %201 }
  0x86   :  { %v205_v34 = vmul.f32 %v1323_v33, %v27_v32 }
  0x88   :  { %930 = vmatmul.mubr.msk.f32.vlgmr.msra.gmra.mrb[6].mxu1 %vm207_vm1, %v205_v34  ;;  %v1366_v62 = vpop.permute.xlu1 %390 }
  0x89   :  { %968 = vmatpush3.msra.mxu1 %v808_v58 }
  0x8a   :  { %1088 = vmatprep.subr.bf16.mxu1 %v1087_v61 }
  0x8e   :  { %v1371_v3 = vpop.permute.xlu1 %394 }
  0xde   :  { %v110_v40 = vpop.f32.mrb[0].mxu1 }
  0xdf   :  { %v1339_v42 = vpop.f32.mrb[1].mxu1 }
  0xe2   :  { %v116_v48 = vpop.f32.mrb[2].mxu1 }
  0xe3   :  { %v1353_v50 = vpop.f32.mrb[3].mxu1 }
 0x15b   :  { %v931_v52 = vpop.f32.mrb[6].mxu1 }
 0x15c   :  { %v286_v53 = vadd.f32 %v931_v52, %v116_v48  ;;  %v280_v54 = vpop.f32.mrb[7].mxu1  ;;  %v837_v48 = vld [vmem:[%s1514_s4 + $0x128] sm:$0xff] }
 0x15d   :  { %v281_v55 = vadd.f32 %v280_v54, %v110_v40  ;;  %v829_v40 = vld [vmem:[%s1512_s2 + $0x10] sm:$0xff]  ;;  %v1127_v49 = vpack.c.bf16 %v837_v48, %v836_v47  ;;  %v841_v54 = vld [vmem:[%s1514_s4 + $0x148] sm:$0xff] }
 0x15f   :  { %1162 = vtanh.f32 %v281_v55 }
 0x160   :  { %1164 = vtanh.f32 %v286_v53  ;;  %v840_v53 = vld [vmem:[%s1514_s4 + $0x140] sm:$0xff] }
 0x161   :  { %v1135_v55 = vpack.c.bf16 %v841_v54, %v840_v53 }
 0x169   :  { %v1163_v56 = vpop.eup %1162 }
 0x16a   :  { %v1165_v57 = vpop.eup %1164  ;;  %964 = vmatprep.mubr.f32.mxu0 %v1163_v56  ;;  %v828_v56 = vld [vmem:[%s1515_s5 + $0x1] ss:$0 sm:$0xff] }
 0x16b   :  { %965 = vmatmul.mubr.f32.vlgmr.msra.gmra.mrb[0].mxu0 %v1165_v57 }
 0x23e   :  { %v966_v0 = vpop.f32.mrb[0].mxu0 }
 0x23f   :  { %v386_v1 = vadd.f32 %v966_v0, %v807_v63  ;;  %v380_v2 = vpop.f32.mrb[1].mxu0 }
 0x240   :  { %v381_v4 = vadd.f32 %v807_v63, %v380_v2 }
 0x241   :  { %v398_v5 = vmul.f32 %v1371_v3, %v386_v1 }
 0x242   :  { %v397_v6 = vmul.f32 %v1366_v62, %v381_v4 }
 0x243   :  { %v400_v7 = vadd.f32 %v398_v5, %v205_v34  ;;  %v842_v5 = vld [vmem:[%s1514_s4 + $0x150] sm:$0xff] }
 0x244   :  { %v399_v8 = vadd.f32 %v397_v6, %v204_v31  ;;  %v826_v31 = vld [vmem:[%s1514_s4 + $0xf8] sm:$0xff] }
 0x245   :  { %v1385_v12 = vmul.f32 %v400_v7, %v1323_v33  ;;  %v1115_v32 = vpack.c.bf16 %v826_v31, %v825_v28  ;;  %v843_v6 = vld [vmem:[%s1514_s4 + $0x158] sm:$0xff] }
 0x246   :  { %v1382_v11 = vmul.f32 %v399_v8, %v1316_v30  ;;  %v1139_v7 = vpack.c.bf16 %v843_v6, %v842_v5  ;;  %v846_v8 = vld [vmem:[%s1514_s4 + $0x170] sm:$0xff] }
 0x248   :  { %969 = vmatprep.mubr.msk.f32.mxu1 %vm207_vm1, %v1382_v11 }
 0x249   :  { %970 = vmatmul.mubr.msk.f32.vlgmr.msra.gmra.mrb[8].mxu1 %vm207_vm1, %v1385_v12 }
 0x24a   :  { %1090 = vmatpush3.bf16.msra.mxu1 %v1087_v61 }
 0x24b   :  { %1092 = vmatprep.subr.bf16.mxu1 %v1091_v13 }
 0x24e   :  { %1094 = vmatpush3.bf16.msra.mxu1 %v1091_v13 }
 0x24f   :  { %1096 = vmatprep.subr.bf16.mxu1 %v1095_v16 }
 0x252   :  { %1098 = vmatpush3.bf16.msra.mxu1 %v1095_v16  ;;  %v849_v16 = vld [vmem:[%s1515_s5 + $0x2] ss:$0 sm:$0xff] }
 0x253   :  { %1100 = vmatprep.subr.bf16.mxu1 %v1099_v19 }
 0x256   :  { %1102 = vmatpush3.bf16.msra.mxu1 %v1099_v19 }
 0x257   :  { %1104 = vmatprep.subr.bf16.mxu1 %v1103_v22 }
 0x25a   :  { %1106 = vmatpush3.bf16.msra.mxu1 %v1103_v22 }
 0x25b   :  { %1108 = vmatprep.subr.bf16.mxu1 %v1107_v25 }
 0x25e   :  { %1110 = vmatpush3.bf16.msra.mxu1 %v1107_v25 }
 0x25f   :  { %1112 = vmatprep.subr.bf16.mxu1 %v1111_v29 }
 0x262   :  { %1114 = vmatpush3.bf16.msra.mxu1 %v1111_v29 }
 0x263   :  { %1116 = vmatprep.subr.bf16.mxu1 %v1115_v32 }
 0x266   :  { %1118 = vmatpush3.bf16.msra.mxu1 %v1115_v32 }
 0x267   :  { %1007 = vmatprep.subr.mxu1 %v829_v40 }
 0x31c   :  { %v971_v34 = vpop.f32.mrb[8].mxu1 }
 0x31d   :  { %v483_v35 = vadd.f32 %v971_v34, %v1353_v50  ;;  %v477_v36 = vpop.f32.mrb[9].mxu1  ;;  %v838_v50 = vld [vmem:[%s1514_s4 + $0x130] sm:$0xff] }
 0x31e   :  { %v478_v37 = vadd.f32 %v477_v36, %v1339_v42  ;;  %v833_v42 = vld [vmem:[%s1514_s4 + $0x108] sm:$0xff]  ;;  %v1131_v52 = vpack.c.bf16 %v839_v51, %v838_v50 }
 0x31f   :  { %v1119_v44 = vpack.c.bf16 %v833_v42, %v832_v41 }
 0x320   :  { %1166 = vtanh.f32 %v478_v37 }
 0x321   :  { %1168 = vtanh.f32 %v483_v35  ;;  %1120 = vmatprep.subr.bf16.mxu0 %v1119_v44 }
 0x322   :  { %1122 = vmatpush3.bf16.msra.mxu0 %v1119_v44 }
 0x323   :  { %1124 = vmatprep.subr.bf16.mxu0 %v1123_v46 }
 0x326   :  { %1126 = vmatpush3.bf16.msra.mxu0 %v1123_v46 }
 0x327   :  { %1128 = vmatprep.subr.bf16.mxu0 %v1127_v49 }
 0x32a   :  { %v1167_v38 = vpop.eup %1166  ;;  %1130 = vmatpush3.bf16.msra.mxu0 %v1127_v49 }
 0x32b   :  { %v1169_v39 = vpop.eup %1168  ;;  %1004 = vmatprep.mubr.f32.mxu1 %v1167_v38  ;;  %1132 = vmatprep.subr.bf16.mxu0 %v1131_v52 }
 0x32c   :  { %1005 = vmatmul.mubr.f32.vlgmr.msra.gmra.mrb[10].mxu1 %v1169_v39 }
 0x32d   :  { %1008 = vmatpush3.msra.mxu1 %v829_v40 }
 0x32e   :  { %1134 = vmatpush3.bf16.msra.mxu0 %v1131_v52 }
 0x32f   :  { %1136 = vmatprep.subr.bf16.mxu0 %v1135_v55 }
 0x332   :  { %1138 = vmatpush3.bf16.msra.mxu0 %v1135_v55 }
 0x333   :  { %1140 = vmatprep.subr.bf16.mxu0 %v1139_v7 }
 0x336   :  { %1142 = vmatpush3.bf16.msra.mxu0 %v1139_v7 }
 0x3ff   :  { %v1006_v57 = vpop.f32.mrb[10].mxu1 }
 0x400   :  { %v585_v58 = vadd.f32 %v1006_v57, %v828_v56  ;;  %v579_v59 = vpop.f32.mrb[11].mxu1 }
 0x401   :  { %v580_v60 = vadd.f32 %v828_v56, %v579_v59 }
 0x402   :  { %v589_v61 = vmul.f32 %v585_v58, %v1371_v3 }
 0x403   :  { %v588_v63 = vmul.f32 %v580_v60, %v1366_v62 }
 0x404   :  { %v591_v0 = vadd.f32 %v589_v61, %v1385_v12 }
 0x405   :  { %v590_v1 = vadd.f32 %v588_v63, %v1382_v11  ;;  %v1147_v11 = vpack.c.bf16 %v847_v10, %v846_v8 }
 0x406   :  { %v593_v4 = vmul.f32 %v591_v0, %v1323_v33  ;;  %v845_v33 = vld [vmem:[%s1514_s4 + $0x168] sm:$0xff] }
 0x407   :  { %v592_v2 = vmul.f32 %v590_v1, %v1316_v30  ;;  %v844_v30 = vld [vmem:[%s1514_s4 + $0x160] sm:$0xff]  ;;  %s1201_s4 = smov [#allocation2]  }
 0x408   :  { %v1143_v9 = vpack.c.bf16 %v845_v33, %v844_v30  ;;  %s790_s2 = sshll.u32 %s1201_s4, 4  ;;  %s791_s2 = int_to_ptr.vmem [resolvable:$true] %s790_s2 }
 0x409   :  { %1009 = vmatprep.mubr.msk.f32.mxu1 %vm207_vm1, %v592_v2  ;;  %s1174_s21 = scalar_lea.vmem %s791_s2, 256  ;;  %p1179_p1 = scmp.lt.s32.totalorder %s791_s2, %s791_s2 }
 0x40a   :  { %1010 = vmatmul.mubr.msk.f32.vlgmr.msra.gmra.mrb[4].mxu1 %vm207_vm1, %v593_v4  ;;  %1144 = vmatprep.subr.bf16.mxu0 %v1143_v9  ;;  %p1175_p0 = scmp.ne.s32.totalorder %s791_s2, %s1174_s21  ;;  %p1180_p2 = scmp.lt.s32.totalorder %s1174_s21, %s1174_s21 }
 0x40b   :  { %1146 = vmatpush3.bf16.msra.mxu0 %v1143_v9 }
 0x40c   :  { %1148 = vmatprep.subr.bf16.mxu0 %v1147_v11  ;;  %p1181_p3 = por %p1180_p2, %p1179_p1 }
 0x40e   :  { %p1182_p4 = pnand %p1181_p3, %p1175_p0 }
 0x40f   :  { %1150 = vmatpush3.bf16.msra.mxu0 %v1147_v11 }
 0x4dd   :  { %v1011_v12 = vpop.f32.mrb[4].mxu1 }
 0x4de   :  { %v668_v13 = vpop.f32.mrb[5].mxu1 }
 0x4df   :  { %1170 = vtanh.f32 %v668_v13 }
 0x4e0   :  { %1172 = vtanh.f32 %v1011_v12 }
 0x4e9   :  { %v1171_v14 = vpop.eup %1170 }
 0x4ea   :  { %v1173_v15 = vpop.eup %1172  ;;  %1044 = vmatprep.mubr.f32.mxu0 %v1171_v14 }
 0x4eb   :  { %1045 = vmatmul.mubr.f32.vlgmr.msra.gmra.mrb[2].mxu0 %v1173_v15 }
 0x5be   :  { %v1046_v17 = vpop.f32.mrb[2].mxu0 }
 0x5bf   :  { %v776_v18 = vadd.f32 %v1046_v17, %v849_v16  ;;  %v770_v19 = vpop.f32.mrb[3].mxu0 }
 0x5c0   :  { %v771_v20 = vadd.f32 %v849_v16, %v770_v19 }
 0x5c1   :  { %v780_v21 = vmul.f32 %v776_v18, %v1371_v3 }
 0x5c2   :  { %v779_v22 = vmul.f32 %v771_v20, %v1366_v62 }
 0x5c3   :  { %v782_v23 = vadd.f32 %v780_v21, %v593_v4 }
 0x5c4   :  { %v781_v24 = vadd.f32 %v779_v22, %v592_v2 }
 0x5c5   :  { %784 = vst.msk [vmem:[#allocation2 + $0x8] sm:$0xff] %vm207_vm1, %v782_v23 }
 0x5c6   :  { %783 = vst.msk [vmem:[#allocation2] sm:$0xff] %vm207_vm1, %v781_v24 }
 0x5c7   :  { %1185 = shalt.err (!%p1182_p4)
}
 0x5c8   :  { %s1186_s23 = scalar_lea.hbm %s1516_s6, 256 }
 0x5c9   :  { %p1187_p5 = scmp.ne.s32.totalorder %s1516_s6, %s1186_s23  ;;  %p1190_p6 = scmp.lt.u32.totalorder %s1186_s23, %s1516_s6 }
 0x5cb   :  { %p1192_p7 = pnand %p1190_p6, %p1187_p5 }
 0x5cd   :  { %1195 = shalt.err (!%p1192_p7)
}
 0x5ce   :  { %s1202_s27 = smov 128   ;;  %s1203_s28 = smov 8  }
 0x5cf   :  { %796 = dma.vmem_to_hbm [thread:$0]  %s791_s2, 256, %s1516_s6, [#allocation3], %s1202_s27, %s1202_s27, %s1203_s28  }
 0x5d0   :  { %1196 = dma.done.wait [#allocation3], 256  }
 0x5d1   :  { %1197 = vsyncadd [#allocation3], 4294967040 }
 0x5d2   :  { %800 = vsyncpa [#allocation3], 1 }

</bundles_post_ra>
